<compile_context>
chip_gen: v6e
topology: v6e:2x2x1
jax: 0.10.0
libtpu: 0.0.40
codegen_flags: <defaults>
</compile_context>

<pallas_src>
import functools
import math

import jax
import jax.numpy as jnp
from jax import lax
from jax.experimental import pallas as pl
from jax.experimental.pallas import tpu as pltpu


def _attention_kernel(use_tanh, C, L, TB, D,
                      q_ref, ref_ref, wqT_ref, bq_ref, wcT_ref, bc_ref, v_ref,
                      e_ref, u_ref):
    """One grid step == TB batch elements.

    q_ref   : (TB, D)      raw query block
    ref_ref : (L, TB, D)   encoder states, original (sourceL, batch, dim) layout
    wqT_ref : (D, D)       Linear weight, [out, in]
    bq_ref  : (D, 1)
    wcT_ref : (D, D)       Conv1d(k=1) weight, [out, in]
    bc_ref  : (D, 1)
    v_ref   : (1, D)
    e_ref   : (D, L*TB)    lane-dense e block; column n = l*TB + b
    u_ref   : (1, L*TB)    lane-dense logits block; column n = l*TB + b
    """
    N = L * TB

    # --- query projection on the MXU, already oriented (D, TB): q_t[d,b] = (q@Wq+bq)[b,d]
    q_t = lax.dot_general(wqT_ref[...], q_ref[...],
                          (((1,), (1,)), ((), ())),
                          preferred_element_type=jnp.float32) + bq_ref[...]

    # --- project_ref (Conv1d, k=1) on the MXU, lane-dense result (D, L*TB) ---
    r2 = ref_ref[...].reshape(N, D)                       # merge leading dims (free)
    e_dn = lax.dot_general(wcT_ref[...], r2,
                           (((1,), (1,)), ((), ())),
                           preferred_element_type=jnp.float32) + bc_ref[...]
    e_ref[...] = e_dn.astype(e_ref.dtype)                 # dense, unmasked stores

    # --- t = tanh(q + e): broadcast q over l by tiling along lanes (n % TB == b) ---
    q_tiled = jnp.concatenate([q_t] * L, axis=1)          # (D, L*TB)
    t = jnp.tanh(e_dn + q_tiled)

    # --- u[n] = sum_d v[d] * t[d, n]  (MXU matvec, stays lane-dense) ---
    u = lax.dot_general(v_ref[...], t, (((1,), (0,)), ((), ())),
                        preferred_element_type=jnp.float32)
    if use_tanh:
        u = C * jnp.tanh(u)
    u_ref[...] = u.astype(u_ref.dtype)


def _pick_tb(B, L, D):
    """Choose (TB, B_pad).

    TB is a multiple of 8 that divides B_pad (B rounded up to a multiple of 8, i.e.
    at most 7 padded rows -- never a TB-sized pad of ref), sized for ~4 MiB
    lane-padded ref blocks, and preferring >= 2 grid steps (v7x has 2 TensorCores).
    """
    if B <= 8:
        return B, B
    B_pad = -(-B // 8) * 8
    lanes = -(-D // 128) * 128                                  # VMEM lane padding
    cap = (4 * 1024 * 1024) // max(1, L * lanes * 4)            # ~4 MiB ref block/step
    cap = max(8, min(B_pad, (cap // 8) * 8))
    divs = [t for t in range(8, B_pad + 1, 8) if B_pad % t == 0 and t <= cap]
    if not divs:
        divs = [8]
    multi = [t for t in divs if 32 <= t <= B_pad // 2]          # >= 2 decent-size steps
    if multi:
        return max(multi), B_pad
    return max(divs), B_pad


def attention_forward(query, ref, wq, bq, wc, bc, v, *, use_tanh=False, C=10.0):
    """
    query : (B, D) float32
    ref   : (L, B, D) float32    (PyTorch "sourceL x batch x hidden_dim")
    wq, wc: (D, D)  stored [in, out]   (i.e. transposed vs. PyTorch's [out, in])
    bq, bc, v: (D,)
    Returns (e, logits) with e: (B, D, L), logits: (B, L)  -- matching PyTorch.
    """
    L, B, D = ref.shape
    TB, B_pad = _pick_tb(B, L, D)
    nb = B_pad // TB
    N = L * TB

    query_in = query.astype(jnp.float32)
    ref_in = ref.astype(jnp.float32)
    if B_pad != B:                       # at most 7 extra rows -- negligible traffic
        query_in = jnp.pad(query_in, ((0, B_pad - B), (0, 0)))
        ref_in = jnp.pad(ref_in, ((0, 0), (0, B_pad - B), (0, 0)))

    # [out, in] orientation so the kernel only needs native trans_b matmuls.
    wqT = jnp.transpose(wq).astype(jnp.float32)
    wcT = jnp.transpose(wc).astype(jnp.float32)
    bq_c = bq.reshape(D, 1).astype(jnp.float32)
    bc_c = bc.reshape(D, 1).astype(jnp.float32)
    v_r = v.reshape(1, D).astype(jnp.float32)

    kernel = functools.partial(_attention_kernel, bool(use_tanh), float(C), L, TB, D)

    e_flat, u_flat = pl.pallas_call(
        kernel,
        out_shape=(
            jax.ShapeDtypeStruct((nb, D, N), jnp.float32),   # e, lane-dense per tile
            jax.ShapeDtypeStruct((nb, 1, N), jnp.float32),   # logits, lane-dense
        ),
        grid_spec=pltpu.PrefetchScalarGridSpec(
            num_scalar_prefetch=0,
            grid=(nb,),
            in_specs=[
                pl.BlockSpec((TB, D), lambda b: (b, 0)),         # query block
                pl.BlockSpec((L, TB, D), lambda b: (0, b, 0)),   # ref block (orig layout)
                pl.BlockSpec((D, D), lambda b: (0, 0)),          # WqT
                pl.BlockSpec((D, 1), lambda b: (0, 0)),          # bq
                pl.BlockSpec((D, D), lambda b: (0, 0)),          # WcT
                pl.BlockSpec((D, 1), lambda b: (0, 0)),          # bc
                pl.BlockSpec((1, D), lambda b: (0, 0)),          # v
            ],
            out_specs=[
                pl.BlockSpec((None, D, N), lambda b: (b, 0, 0)),  # e block
                pl.BlockSpec((None, 1, N), lambda b: (b, 0, 0)),  # logits block
            ],
        ),
        compiler_params=pltpu.CompilerParams(
            dimension_semantics=("parallel",),
            vmem_limit_bytes=48 * 1024 * 1024),
    )(query_in, ref_in, wqT, bq_c, wcT, bc_c, v_r)

    # Epilogue: one fused reshape/transpose/slice per output to present the PyTorch
    # layouts. Column n inside tile t encodes (l, b_local) = (n // TB, n % TB).
    e = (e_flat.reshape(nb, D, L, TB)
               .transpose(0, 3, 1, 2)          # (nb, TB, D, L)
               .reshape(B_pad, D, L)[:B])
    logits = (u_flat.reshape(nb, L, TB)
                    .transpose(0, 2, 1)        # (nb, TB, L)
                    .reshape(B_pad, L)[:B])
    return e, logits


def _reference(query, ref, wq, bq, wc, bc, v, use_tanh=False, C=10.0):
    """Pure-JAX reference mirroring the PyTorch forward."""
    ref_bdl = jnp.transpose(ref, (1, 2, 0))                           # (B, D, L)
    q = query @ wq + bq                                               # (B, D)
    e = jnp.einsum('oi,bil->bol', wc.T, ref_bdl) + bc[None, :, None]  # (B, D, L)
    t = jnp.tanh(q[:, :, None] + e)                                   # (B, D, L)
    u = jnp.einsum('d,bdl->bl', v, t)                                 # (B, L)
    logits = C * jnp.tanh(u) if use_tanh else u
    return e, logits


if __name__ == "__main__":
    B, L, D = 2, 8, 32
    use_tanh = True
    C = 10.0

    key = jax.random.PRNGKey(0)
    k1, k2, k3, k4, k5, k6, k7 = jax.random.split(key, 7)

    query = jax.random.normal(k1, (B, D), dtype=jnp.float32)
    ref = jax.random.normal(k2, (L, B, D), dtype=jnp.float32)

    # Deterministic parameter init (shapes from nn.Linear / nn.Conv1d / v).
    bound = 1.0 / math.sqrt(D)
    wq = jax.random.uniform(k3, (D, D), jnp.float32, -bound, bound)   # [in, out]
    bq = jax.random.uniform(k4, (D,), jnp.float32, -bound, bound)
    wc = jax.random.uniform(k5, (D, D), jnp.float32, -bound, bound)   # [in, out]
    bc = jax.random.uniform(k6, (D,), jnp.float32, -bound, bound)
    v = jax.random.uniform(k7, (D,), jnp.float32, -bound, bound)

    e, logits = attention_forward(query, ref, wq, bq, wc, bc, v,
                                  use_tanh=use_tanh, C=C)
    jax.block_until_ready((e, logits))

    e_ref, logits_ref = _reference(query, ref, wq, bq, wc, bc, v,
                                   use_tanh=use_tanh, C=C)
    assert e.shape == (B, D, L) and logits.shape == (B, L)
    assert jnp.allclose(e, e_ref, atol=1e-5, rtol=1e-5)
    assert jnp.allclose(logits, logits_ref, atol=1e-5, rtol=1e-5)

    print("KERNEL_OK")
</pallas_src>

<mosaic_0001>
module attributes {stable_mosaic.version = 11 : i64} {
  func.func @_attention_kernel(%arg0: i32, %arg1: memref<2x32xf32, #tpu.memory_space<vmem>>, %arg2: memref<8x2x32xf32, #tpu.memory_space<vmem>>, %arg3: memref<32x32xf32, #tpu.memory_space<vmem>>, %arg4: memref<32x1xf32, #tpu.memory_space<vmem>>, %arg5: memref<32x32xf32, #tpu.memory_space<vmem>>, %arg6: memref<32x1xf32, #tpu.memory_space<vmem>>, %arg7: memref<1x32xf32, #tpu.memory_space<vmem>>, %arg8: memref<1x32x16xf32, #tpu.memory_space<vmem>>, %arg9: memref<1x1x16xf32, #tpu.memory_space<vmem>>) attributes {dimension_semantics = [#tpu.dimension_semantics<parallel>], iteration_bounds = array<i64: 1>, scalar_prefetch = 0 : i64, scratch_operands = 0 : i64, tpu.core_type = #tpu.core_type<tc>, window_params = [{transform_indices = @transform_0, window_bounds = array<i64: 2, 32>}, {transform_indices = @transform_1, window_bounds = array<i64: 8, 2, 32>}, {pipeline_mode = #tpu.pipeline_mode<synchronous>, transform_indices = @transform_2, window_bounds = array<i64: 32, 32>}, {pipeline_mode = #tpu.pipeline_mode<synchronous>, transform_indices = @transform_3, window_bounds = array<i64: 32, 1>}, {pipeline_mode = #tpu.pipeline_mode<synchronous>, transform_indices = @transform_4, window_bounds = array<i64: 32, 32>}, {pipeline_mode = #tpu.pipeline_mode<synchronous>, transform_indices = @transform_5, window_bounds = array<i64: 32, 1>}, {pipeline_mode = #tpu.pipeline_mode<synchronous>, transform_indices = @transform_6, window_bounds = array<i64: 1, 32>}, {transform_indices = @transform_7, window_bounds = array<i64: 1, 32, 16>}, {transform_indices = @transform_8, window_bounds = array<i64: 1, 1, 16>}]} {
    %c0 = arith.constant 0 : index
    %c0_0 = arith.constant 0 : index
    %0 = vector.load %arg3[%c0, %c0_0] : memref<32x32xf32, #tpu.memory_space<vmem>>, vector<32x32xf32>
    %c0_1 = arith.constant 0 : index
    %c0_2 = arith.constant 0 : index
    %1 = vector.load %arg1[%c0_1, %c0_2] : memref<2x32xf32, #tpu.memory_space<vmem>>, vector<2x32xf32>
    %cst = arith.constant dense<0.000000e+00> : vector<32x2xf32>
    %2 = tpu.matmul %0, %1, %cst {dimension_numbers = #tpu.dot_dimension_numbers<[1], [1], [0], [0], [0, 0, 1, 0], [], []>} : vector<32x32xf32>, vector<2x32xf32>, vector<32x2xf32> -> vector<32x2xf32>
    %c0_3 = arith.constant 0 : index
    %c0_4 = arith.constant 0 : index
    %3 = vector.load %arg4[%c0_3, %c0_4] : memref<32x1xf32, #tpu.memory_space<vmem>>, vector<32x1xf32>
    %4 = vector.broadcast %3 : vector<32x1xf32> to vector<32x2xf32>
    %5 = arith.addf %2, %4 : vector<32x2xf32>
    %c0_5 = arith.constant 0 : index
    %c0_6 = arith.constant 0 : index
    %c0_7 = arith.constant 0 : index
    %6 = vector.load %arg2[%c0_5, %c0_6, %c0_7] : memref<8x2x32xf32, #tpu.memory_space<vmem>>, vector<8x2x32xf32>
    %7 = vector.shape_cast %6 : vector<8x2x32xf32> to vector<16x32xf32>
    %c0_8 = arith.constant 0 : index
    %c0_9 = arith.constant 0 : index
    %8 = vector.load %arg5[%c0_8, %c0_9] : memref<32x32xf32, #tpu.memory_space<vmem>>, vector<32x32xf32>
    %cst_10 = arith.constant dense<0.000000e+00> : vector<32x16xf32>
    %9 = tpu.matmul %8, %7, %cst_10 {dimension_numbers = #tpu.dot_dimension_numbers<[1], [1], [0], [0], [0, 0, 1, 0], [], []>} : vector<32x32xf32>, vector<16x32xf32>, vector<32x16xf32> -> vector<32x16xf32>
    %c0_11 = arith.constant 0 : index
    %c0_12 = arith.constant 0 : index
    %10 = vector.load %arg6[%c0_11, %c0_12] : memref<32x1xf32, #tpu.memory_space<vmem>>, vector<32x1xf32>
    %11 = vector.broadcast %10 : vector<32x1xf32> to vector<32x16xf32>
    %12 = arith.addf %9, %11 : vector<32x16xf32>
    %c0_13 = arith.constant 0 : index
    %c0_14 = arith.constant 0 : index
    %c0_15 = arith.constant 0 : index
    %13 = vector.load %arg8[%c0_13, %c0_14, %c0_15] : memref<1x32x16xf32, #tpu.memory_space<vmem>>, vector<1x32x16xf32>
    %14 = vector.shape_cast %13 : vector<1x32x16xf32> to vector<32x16xf32>
    %15 = vector.shape_cast %12 : vector<32x16xf32> to vector<1x32x16xf32>
    tpu.vector_store %arg8[%c0_13, %c0_14, %c0_15], %15 {strides = array<i32>} : memref<1x32x16xf32, #tpu.memory_space<vmem>>, vector<1x32x16xf32>,
    %16 = tpu.concatenate %5, %5, %5, %5, %5, %5, %5, %5 in 1 : vector<32x2xf32>, vector<32x2xf32>, vector<32x2xf32>, vector<32x2xf32>, vector<32x2xf32>, vector<32x2xf32>, vector<32x2xf32>, vector<32x2xf32> -> vector<32x16xf32>
    %17 = arith.addf %12, %16 : vector<32x16xf32>
    %18 = math.tanh %17 : vector<32x16xf32>
    %c0_16 = arith.constant 0 : index
    %c0_17 = arith.constant 0 : index
    %19 = vector.load %arg7[%c0_16, %c0_17] : memref<1x32xf32, #tpu.memory_space<vmem>>, vector<1x32xf32>
    %cst_18 = arith.constant dense<0.000000e+00> : vector<1x16xf32>
    %20 = tpu.matmul %19, %18, %cst_18 {dimension_numbers = #tpu.dot_dimension_numbers<[1], [0], [0], [1], [0, 0, 1, 1], [], []>} : vector<1x32xf32>, vector<32x16xf32>, vector<1x16xf32> -> vector<1x16xf32>
    %21 = math.tanh %20 : vector<1x16xf32>
    %cst_19 = arith.constant 1.000000e+01 : f32
    %22 = vector.broadcast %cst_19 : f32 to vector<1x16xf32>
    %23 = arith.mulf %22, %21 : vector<1x16xf32>
    %c0_20 = arith.constant 0 : index
    %c0_21 = arith.constant 0 : index
    %c0_22 = arith.constant 0 : index
    %24 = vector.load %arg9[%c0_20, %c0_21, %c0_22] : memref<1x1x16xf32, #tpu.memory_space<vmem>>, vector<1x1x16xf32>
    %25 = vector.shape_cast %24 : vector<1x1x16xf32> to vector<1x16xf32>
    %26 = vector.shape_cast %23 : vector<1x16xf32> to vector<1x1x16xf32>
    tpu.vector_store %arg9[%c0_20, %c0_21, %c0_22], %26 {strides = array<i32>} : memref<1x1x16xf32, #tpu.memory_space<vmem>>, vector<1x1x16xf32>,
    return
  }
  func.func @transform_0(%arg0: i32) -> (i32, i32) {
    %c0_i32 = arith.constant 0 : i32
    %c0_i32_0 = arith.constant 0 : i32
    return %arg0, %c0_i32 : i32, i32
  }
  func.func @transform_1(%arg0: i32) -> (i32, i32, i32) {
    %c0_i32 = arith.constant 0 : i32
    %c0_i32_0 = arith.constant 0 : i32
    %c0_i32_1 = arith.constant 0 : i32
    return %c0_i32, %arg0, %c0_i32_0 : i32, i32, i32
  }
  func.func @transform_2(%arg0: i32) -> (i32, i32) {
    %c0_i32 = arith.constant 0 : i32
    %c0_i32_0 = arith.constant 0 : i32
    %c0_i32_1 = arith.constant 0 : i32
    return %c0_i32, %c0_i32_0 : i32, i32
  }
  func.func @transform_3(%arg0: i32) -> (i32, i32) {
    %c0_i32 = arith.constant 0 : i32
    %c0_i32_0 = arith.constant 0 : i32
    %c0_i32_1 = arith.constant 0 : i32
    return %c0_i32, %c0_i32_0 : i32, i32
  }
  func.func @transform_4(%arg0: i32) -> (i32, i32) {
    %c0_i32 = arith.constant 0 : i32
    %c0_i32_0 = arith.constant 0 : i32
    %c0_i32_1 = arith.constant 0 : i32
    return %c0_i32, %c0_i32_0 : i32, i32
  }
  func.func @transform_5(%arg0: i32) -> (i32, i32) {
    %c0_i32 = arith.constant 0 : i32
    %c0_i32_0 = arith.constant 0 : i32
    %c0_i32_1 = arith.constant 0 : i32
    return %c0_i32, %c0_i32_0 : i32, i32
  }
  func.func @transform_6(%arg0: i32) -> (i32, i32) {
    %c0_i32 = arith.constant 0 : i32
    %c0_i32_0 = arith.constant 0 : i32
    %c0_i32_1 = arith.constant 0 : i32
    return %c0_i32, %c0_i32_0 : i32, i32
  }
  func.func @transform_7(%arg0: i32) -> (i32, i32, i32) {
    %c0_i32 = arith.constant 0 : i32
    %c0_i32_0 = arith.constant 0 : i32
    %c0_i32_1 = arith.constant 0 : i32
    return %arg0, %c0_i32, %c0_i32_0 : i32, i32, i32
  }
  func.func @transform_8(%arg0: i32) -> (i32, i32, i32) {
    %c0_i32 = arith.constant 0 : i32
    %c0_i32_0 = arith.constant 0 : i32
    %c0_i32_1 = arith.constant 0 : i32
    return %arg0, %c0_i32, %c0_i32_0 : i32, i32, i32
  }
}

</mosaic_0001>

<bundles_post_ra>
// kernel: tpu_custom_call.1
= control target key start
LH: loop header
LB: loop body
LE: loop exit
PB: predicated region body
PF: predicated region fallthrough
CT: control target
= control target key end

     0   :  { %14 = vsyncpa [#allocation3], 0  ;;  %s952_s0 = inlined_call_operand.vmem [shape: f32[2,32], index: 0, kind: input, shape index: {}]   ;;  %s953_s1 = inlined_call_operand.hbm [shape: f32[8,2,32], index: 1, kind: input, shape index: {}]   ;;  %s954_s2 = inlined_call_operand.vmem [shape: f32[32,32], index: 2, kind: input, shape index: {}]   ;;  %s955_s3 = inlined_call_operand.vmem [shape: f32[32,1], index: 3, kind: input, shape index: {}]   ;;  %s956_s4 = inlined_call_operand.vmem [shape: f32[32,32], index: 4, kind: input, shape index: {}]   ;;  %s957_s5 = inlined_call_operand.vmem [shape: f32[32,1], index: 5, kind: input, shape index: {}]   ;;  %s958_s6 = inlined_call_operand.vmem [shape: f32[1,32], index: 6, kind: input, shape index: {}]   ;;  %s959_s7 = inlined_call_operand.vmem [shape: f32[1,32,16], index: 7, kind: output, shape index: {0}]   ;;  %s960_s8 = inlined_call_operand.hbm [shape: f32[1,1,16], index: 8, kind: output, shape index: {1}]  }
   0x1   :  { %15 = vsyncpa [#allocation4], 0  ;;  %s712_s27 = smov [#allocation2]  }
   0x2   :  { %s23_s28 = sshll.u32 %s712_s27, 4  ;;  %s24_s28 = int_to_ptr.vmem [resolvable:$true] %s23_s28 }
   0x3   :  { %s676_s29 = scalar_lea.vmem %s24_s28, 256  ;;  %p681_p1 = scmp.lt.s32.totalorder %s24_s28, %s24_s28 }
   0x4   :  { %p677_p0 = scmp.ne.s32.totalorder %s24_s28, %s676_s29  ;;  %p682_p2 = scmp.lt.s32.totalorder %s676_s29, %s676_s29 }
   0x6   :  { %p683_p3 = por %p682_p2, %p681_p1 }
   0x8   :  { %p684_p4 = pnand %p683_p3, %p677_p0 }
   0xa   :  { %687 = shalt.err (!%p684_p4)
}
   0xb   :  { %s713_s30 = smov 32   ;;  %s714_s9 = smov 2  }
   0xc   :  { %29 = dma.hbm_to_vmem [thread:$0]  %s953_s1, 256, %s24_s28, [#allocation3], %s713_s30, %s713_s30, %s714_s9  }
   0xd   :  { %708 = dma.done.wait [#allocation3], 256  }
   0xe   :  { %709 = vsyncadd [#allocation3], 4294967040  ;;  %v222_v0 = vlaneseq  ;;  %v715_v1 = vmov 1983009808   ;;  %v716_v3 = vmov 0   ;;  %vm72_vm0 = vcmask 261120  }
   0xf   :  { %v220_v2 = vunpack.c.l.s4 %v715_v1  ;;  %657 = vset.pattern.permute.xlu1 %v716_v3  ;;  %656 = vset.pattern.permute.xlu0 %v716_v3  ;;  %v47_v6 = vld [vmem:[%s952_s0] sm:$0x3]  ;;  %v44_v8 = vld [vmem:[%s954_s2 + $0x8] sm:$0xff]  ;;  %v174_v16 = vld [vmem:[#allocation2 + $0x2] sm:$0x3]  ;;  %s717_s19 = smov 4  }
  0x10   :  { %v223_v5 = vshrl.u32 %v222_v0, 7  ;;  %v43_v7 = vld [vmem:[%s954_s2] sm:$0xff]  ;;  %613 = vmatprep.subr.msk.mxu0 %vm72_vm0, %v47_v6  ;;  %v177_v10 = vld [vmem:[#allocation2 + $0x8] sm:$0x3]  ;;  %v178_v11 = vld [vmem:[#allocation2 + $0xa] sm:$0x3] }
  0x11   :  { %v221_v4 = vunpack.c.0.s8 %v220_v2  ;;  %615 = vmatprep.mubr.msk.f32.mxu0 %vm72_vm0, %v43_v7  ;;  %v179_v12 = vld [vmem:[#allocation2 + $0xc] sm:$0x3]  ;;  %614 = vmatpush3.xpose.msk.msra.mxu0 %vm72_vm0, %v47_v6  ;;  %v180_v13 = vld [vmem:[#allocation2 + $0xe] sm:$0x3]  ;;  %v234_v14 = vcombine.low %v177_v10, %v178_v11  ;;  %v173_v15 = vld [vmem:[#allocation2] sm:$0x3] }
  0x12   :  { %v235_v17 = vcombine.low %v179_v12, %v180_v13  ;;  %v175_v18 = vld [vmem:[#allocation2 + $0x4] sm:$0x3]  ;;  %v176_v19 = vld [vmem:[#allocation2 + $0x6] sm:$0x3]  ;;  %v217_v20 = vcombine.low %v173_v15, %v174_v16  ;;  %v45_v26 = vld [vmem:[%s954_s2 + $0x10] sm:$0xff]  ;;  %s720_s20 = smov 8  }
  0x13   :  { %v224_v9 = vsub.s32 %v221_v4, %v223_v5  ;;  %v181_v21 = vld [vmem:[%s956_s4] sm:$0xff]  ;;  %v218_v23 = vcombine.low %v175_v18, %v176_v19  ;;  %v49_v27 = vld [vmem:[%s955_s3 + $0x8] sm:$0xff]  ;;  %v46_v29 = vld [vmem:[%s954_s2 + $0x18] sm:$0xff]  ;;  %vm352_vm1 = vcmask 130048   ;;  %s721_s21 = smov 12   ;;  %s722_s26 = smov 14  }
  0x14   :  { %625 = vmatprep.mubr.msk.f32.mxu1 %vm72_vm0, %v181_v21  ;;  %616 = vmatmul.mubr.msk.f32.vlgmr.msra.gmra.mxu0 %vm72_vm0, %v44_v8  ;;  %v48_v31 = vld [vmem:[%s955_s3] sm:$0xff]  ;;  %v51_v32 = vld [vmem:[%s955_s3 + $0x18] sm:$0xff]  ;;  %v50_v34 = vld [vmem:[%s955_s3 + $0x10] sm:$0xff]  ;;  %v723_v2 = vmov 0.0   ;;  %vm724_vm2 = vmmov 0   ;;  %vm445_vm3 = vcmask 15360  }
  0x15   :  { %v242_v22 = vrot.slane %v234_v14, %v224_v9  ;;  %v249_v24 = vrot.slane %v235_v17, %v224_v9  ;;  %v225_v25 = vrot.slane %v217_v20, %v224_v9  ;;  %v232_v28 = vrot.slane %v218_v23, %v224_v9  ;;  %618 = vmatprep.mubr.msk.f32.mxu0 %vm72_vm0, %v45_v26  ;;  %v187_v35 = vld [vmem:[%s957_s5 + $0x10] sm:$0xff]  ;;  %v188_v36 = vld [vmem:[%s957_s5 + $0x18] sm:$0xff]  ;;  %v182_v37 = vld [vmem:[%s956_s4 + $0x8] sm:$0xff]  ;;  %s725_s30 = smov [#allocation5]  }
  0x16   :  { %59 = vperm.xlu1 %657, %v49_v27   ;;  %69 = vperm.xlu0 %656, %v51_v32   ;;  %v183_v38 = vld [vmem:[%s956_s4 + $0x10] sm:$0xff]  ;;  %v185_v39 = vld [vmem:[%s957_s5] sm:$0xff]  ;;  %v186_v40 = vld [vmem:[%s957_s5 + $0x8] sm:$0xff]  ;;  %s719_s5 = smov 6   ;;  %vm450_vm4 = vcmask 31744   ;;  %vm455_vm5 = vcmask 48128  }
  0x17   :  { %v250_v30 = vcombine.low %v242_v22, %v249_v24  ;;  %v233_v33 = vcombine.low %v225_v25, %v232_v28  ;;  %v184_v41 = vld [vmem:[%s956_s4 + $0x18] sm:$0xff]  ;;  %s718_s4 = smov 10   ;;  %631 = vmatprep.subr.mxu0 %v723_v2  ;;  %vm460_vm6 = vcmask 64512   ;;  %vm465_vm7 = vcmask 80896   ;;  %s574_s10 = sshll.u32 %s725_s30, 4  ;;  %s575_s10 = int_to_ptr.vmem [resolvable:$true] %s574_s10 }
  0x18   :  { %619 = vmatmul.mubr.msk.f32.gmra.mxu0 %vm72_vm0, %v46_v29  ;;  %vm470_vm8 = vcmask 97280   ;;  %vm475_vm9 = vcmask 113664   ;;  %vm564_vm10 = vcmask 122880   ;;  %s688_s11 = scalar_lea.vmem %s575_s10, 16  ;;  %s692_s12 = scalar_lea.vmem %s575_s10, 32 }
  0x19   :  { %621 = vmatprep.subr.msk.mxu1 %vm72_vm0, %v250_v30  ;;  %639 = vmatprep.mubr.msk.f32.mxu0 %vm724_vm2, %v723_v2  ;;  %p689_p5 = scmp.ne.s32.totalorder %s575_s10, %s688_s11  ;;  %p693_p6 = scmp.lt.s32.totalorder %s575_s10, %s575_s10 }
  0x1a   :  { %622 = vmatpush3.xpose.msk.msra.mxu1 %vm72_vm0, %v250_v30  ;;  %54 = vperm.xlu1 %657, %v48_v31   ;;  %p694_p7 = scmp.lt.s32.totalorder %s692_s12, %s688_s11 }
  0x1b   :  { %623 = vmatprep.subr.msk.mxu1 %vm72_vm0, %v233_v33  ;;  %64 = vperm.xlu0 %656, %v50_v34  }
  0x1c   :  { %p695_p8 = por %p694_p7, %p693_p6 }
  0x1e   :  { %624 = vmatpush3.xpose.msk.msra.mxu1 %vm72_vm0, %v233_v33  ;;  %201 = vperm.xlu1 %657, %v187_v35   ;;  %p696_p9 = pnand %p695_p8, %p689_p5 }
  0x1f   :  { %206 = vperm.xlu0 %656, %v188_v36  }
  0x21   :  { %626 = vmatmul.mubr.msk.f32.vlgmr.msra.gmra.mxu1 %vm72_vm0, %v182_v37 }
  0x22   :  { %628 = vmatprep.mubr.msk.f32.mxu1 %vm72_vm0, %v183_v38  ;;  %191 = vperm.xlu1 %657, %v185_v39  }
  0x23   :  { %196 = vperm.xlu0 %656, %v186_v40  }
  0x25   :  { %629 = vmatmul.mubr.msk.f32.gmra.mxu1 %vm72_vm0, %v184_v41 }
  0x91   :  { %v70_v42 = vpop.permute.xlu0 %69  ;;  %v60_v43 = vpop.permute.xlu1 %59 }
  0x95   :  { %v55_v47 = vpop.permute.xlu1 %54 }
  0x96   :  { %v65_v44 = vpop.permute.xlu0 %64 }
  0x99   :  { %v202_v50 = vpop.permute.xlu1 %201 }
  0x9a   :  { %v207_v48 = vpop.permute.xlu0 %206 }
  0x9d   :  { %v192_v55 = vpop.permute.xlu1 %191 }
  0x9e   :  { %v197_v52 = vpop.permute.xlu0 %196 }
  0xd4   :  { %v617_v45 = vpop.f32.mrf.mxu0 }
  0xd5   :  { %v840_v46 = vadd.f32 %v617_v45, %v60_v43 }
  0xd6   :  { %v154_v49 = vpop.f32.mrf.mxu0 }
  0xd7   :  { %375 = vrot.lane.b32.xlu0 %v840_v46, %s717_s19  ;;  %363 = vrot.lane.b32.xlu1 %v840_v46, %s714_s9  ;;  %v850_v51 = vadd.f32 %v154_v49, %v55_v47 }
  0xd8   :  { %v620_v62 = vpop.f32.mrf.mxu0 }
  0xd9   :  { %v170_v63 = vadd.f32 %v620_v62, %v70_v42 }
  0xda   :  { %v164_v0 = vpop.f32.mrf.mxu0 }
  0xdb   :  { %411 = vrot.lane.b32.xlu0 %v840_v46, %s718_s4  ;;  %387 = vrot.lane.b32.xlu1 %v840_v46, %s719_s5  ;;  %v165_v1 = vadd.f32 %v164_v0, %v65_v44 }
  0xdf   :  { %399 = vrot.lane.b32.xlu1 %v840_v46, %s720_s20  ;;  %361 = vrot.lane.b32.xlu0 %v850_v51, %s714_s9 }
  0xe1   :  { %v627_v53 = vpop.f32.mrf.mxu1 }
  0xe2   :  { %v856_v54 = vadd.f32 %v627_v53, %v197_v52 }
  0xe3   :  { %v333_v56 = vpop.f32.mrf.mxu1  ;;  %423 = vrot.lane.b32.xlu1 %v840_v46, %s721_s21  ;;  %373 = vrot.lane.b32.xlu0 %v850_v51, %s717_s19 }
  0xe4   :  { %v858_v57 = vadd.f32 %v333_v56, %v192_v55  ;;  %354 = vst.msk [vmem:[%s959_s7 + $0x8] sm:$0xff] %vm352_vm1, %v856_v54 }
  0xe5   :  { %v630_v58 = vpop.f32.mrf.mxu1 }
  0xe6   :  { %353 = vst.msk [vmem:[%s959_s7] sm:$0xff] %vm352_vm1, %v858_v57  ;;  %v872_v59 = vadd.f32 %v630_v58, %v207_v48 }
  0xe7   :  { %v343_v60 = vpop.f32.mrf.mxu1  ;;  %435 = vrot.lane.b32.xlu1 %v840_v46, %s722_s26  ;;  %397 = vrot.lane.b32.xlu0 %v850_v51, %s720_s20 }
  0xe8   :  { %v874_v61 = vadd.f32 %v343_v60, %v202_v50  ;;  %356 = vst.msk [vmem:[%s959_s7 + $0x18] sm:$0xff] %vm352_vm1, %v872_v59 }
  0xea   :  { %355 = vst.msk [vmem:[%s959_s7 + $0x10] sm:$0xff] %vm352_vm1, %v874_v61 }
  0xeb   :  { %385 = vrot.lane.b32.xlu1 %v850_v51, %s719_s5  ;;  %409 = vrot.lane.b32.xlu0 %v850_v51, %s718_s4 }
  0xef   :  { %367 = vrot.lane.b32.xlu1 %v170_v63, %s714_s9  ;;  %379 = vrot.lane.b32.xlu0 %v170_v63, %s717_s19 }
  0xf3   :  { %391 = vrot.lane.b32.xlu1 %v170_v63, %s719_s5  ;;  %427 = vrot.lane.b32.xlu0 %v170_v63, %s721_s21 }
  0xf7   :  { %403 = vrot.lane.b32.xlu1 %v170_v63, %s720_s20  ;;  %365 = vrot.lane.b32.xlu0 %v165_v1, %s714_s9 }
  0xfb   :  { %415 = vrot.lane.b32.xlu1 %v170_v63, %s718_s4  ;;  %377 = vrot.lane.b32.xlu0 %v165_v1, %s717_s19 }
  0xff   :  { %439 = vrot.lane.b32.xlu1 %v170_v63, %s722_s26  ;;  %389 = vrot.lane.b32.xlu0 %v165_v1, %s719_s5 }
 0x103   :  { %401 = vrot.lane.b32.xlu1 %v165_v1, %s720_s20  ;;  %413 = vrot.lane.b32.xlu0 %v165_v1, %s718_s4 }
 0x107   :  { %437 = vrot.lane.b32.xlu1 %v165_v1, %s722_s26  ;;  %425 = vrot.lane.b32.xlu0 %v165_v1, %s721_s21 }
 0x10b   :  { %433 = vrot.lane.b32.xlu1 %v850_v51, %s722_s26  ;;  %421 = vrot.lane.b32.xlu0 %v850_v51, %s721_s21 }
 0x149   :  { %v376_v3 = vpop.permute.xlu0 %375  ;;  %v364_v4 = vpop.permute.xlu1 %363 }
 0x14a   :  { %v447_v28 = vsel %vm445_vm3, %v840_v46, %v364_v4  ;;  %v488_v4 = vld [vmem:[%s958_s6] sm:$0x1] }
 0x14b   :  { %v452_v32 = vsel %vm450_vm4, %v447_v28, %v376_v3 }
 0x14d   :  { %v412_v5 = vpop.permute.xlu0 %411  ;;  %v388_v6 = vpop.permute.xlu1 %387 }
 0x14e   :  { %v457_v34 = vsel %vm455_vm5, %v452_v32, %v388_v6 }
 0x151   :  { %v400_v7 = vpop.permute.xlu1 %399  ;;  %v362_v8 = vpop.permute.xlu0 %361 }
 0x152   :  { %v462_v37 = vsel %vm460_vm6, %v457_v34, %v400_v7  ;;  %v446_v39 = vsel %vm445_vm3, %v850_v51, %v362_v8 }
 0x153   :  { %v467_v45 = vsel %vm465_vm7, %v462_v37, %v412_v5 }
 0x155   :  { %v424_v9 = vpop.permute.xlu1 %423  ;;  %v374_v10 = vpop.permute.xlu0 %373 }
 0x156   :  { %v451_v43 = vsel %vm450_vm4, %v446_v39, %v374_v10  ;;  %v472_v47 = vsel %vm470_vm8, %v467_v45, %v424_v9 }
 0x159   :  { %v436_v11 = vpop.permute.xlu1 %435  ;;  %v398_v12 = vpop.permute.xlu0 %397 }
 0x15a   :  { %v477_v48 = vsel %vm475_vm9, %v472_v47, %v436_v11 }
 0x15b   :  { %v481_v56 = vadd.f32 %v477_v48, %v856_v54 }
 0x15d   :  { %v386_v13 = vpop.permute.xlu1 %385  ;;  %v410_v14 = vpop.permute.xlu0 %409 }
 0x15e   :  { %v456_v46 = vsel %vm455_vm5, %v451_v43, %v386_v13 }
 0x15f   :  { %v461_v52 = vsel %vm460_vm6, %v456_v46, %v398_v12 }
 0x161   :  { %v368_v15 = vpop.permute.xlu1 %367  ;;  %v380_v16 = vpop.permute.xlu0 %379 }
 0x162   :  { %v449_v19 = vsel %vm445_vm3, %v170_v63, %v368_v15 }
 0x163   :  { %v454_v22 = vsel %vm450_vm4, %v449_v19, %v380_v16 }
 0x165   :  { %v392_v17 = vpop.permute.xlu1 %391  ;;  %v428_v18 = vpop.permute.xlu0 %427 }
 0x166   :  { %v459_v23 = vsel %vm455_vm5, %v454_v22, %v392_v17 }
 0x169   :  { %v404_v20 = vpop.permute.xlu1 %403  ;;  %v366_v21 = vpop.permute.xlu0 %365 }
 0x16a   :  { %v464_v24 = vsel %vm460_vm6, %v459_v23, %v404_v20  ;;  %v448_v35 = vsel %vm445_vm3, %v165_v1, %v366_v21 }
 0x16d   :  { %v416_v25 = vpop.permute.xlu1 %415  ;;  %v378_v26 = vpop.permute.xlu0 %377 }
 0x16e   :  { %v469_v27 = vsel %vm465_vm7, %v464_v24, %v416_v25  ;;  %v453_v38 = vsel %vm450_vm4, %v448_v35, %v378_v26 }
 0x16f   :  { %v474_v30 = vsel %vm470_vm8, %v469_v27, %v428_v18 }
 0x171   :  { %v440_v29 = vpop.permute.xlu1 %439  ;;  %v390_v31 = vpop.permute.xlu0 %389 }
 0x172   :  { %v479_v33 = vsel %vm475_vm9, %v474_v30, %v440_v29  ;;  %v458_v40 = vsel %vm455_vm5, %v453_v38, %v390_v31 }
 0x173   :  { %v483_v36 = vadd.f32 %v479_v33, %v872_v59  ;;  %v466_v59 = vsel %vm465_vm7, %v461_v52, %v410_v14 }
 0x175   :  { %658 = vtanh.f32 %v483_v36  ;;  %v402_v41 = vpop.permute.xlu1 %401  ;;  %v414_v42 = vpop.permute.xlu0 %413 }
 0x176   :  { %v463_v44 = vsel %vm460_vm6, %v458_v40, %v402_v41 }
 0x177   :  { %v468_v49 = vsel %vm465_vm7, %v463_v44, %v414_v42 }
 0x179   :  { %v438_v50 = vpop.permute.xlu1 %437  ;;  %v426_v51 = vpop.permute.xlu0 %425 }
 0x17a   :  { %v473_v53 = vsel %vm470_vm8, %v468_v49, %v426_v51 }
 0x17b   :  { %v478_v55 = vsel %vm475_vm9, %v473_v53, %v438_v50 }
 0x17c   :  { %v482_v58 = vadd.f32 %v478_v55, %v874_v61 }
 0x17d   :  { %v434_v60 = vpop.permute.xlu1 %433  ;;  %v422_v62 = vpop.permute.xlu0 %421 }
 0x17e   :  { %660 = vtanh.f32 %v482_v58  ;;  %v471_v63 = vsel %vm470_vm8, %v466_v59, %v422_v62 }
 0x17f   :  { %v476_v0 = vsel %vm475_vm9, %v471_v63, %v434_v60  ;;  %662 = vtanh.f32 %v481_v56 }
 0x180   :  { %v480_v1 = vadd.f32 %v476_v0, %v858_v57 }
 0x182   :  { %v659_v3 = vpop.eup %658  ;;  %664 = vtanh.f32 %v480_v1 }
 0x183   :  { %632 = vmatpush3.msra.mxu0 %v659_v3 }
 0x184   :  { %633 = vmatprep.subr.mxu0 %v723_v2 }
 0x18b   :  { %v661_v54 = vpop.eup %660 }
 0x18c   :  { %634 = vmatpush3.msra.mxu0 %v661_v54  ;;  %v663_v61 = vpop.eup %662 }
 0x18d   :  { %635 = vmatprep.subr.mxu0 %v723_v2 }
 0x18e   :  { %636 = vmatpush3.msra.mxu0 %v663_v61 }
 0x18f   :  { %v665_v5 = vpop.eup %664  ;;  %637 = vmatprep.subr.mxu0 %v723_v2 }
 0x190   :  { %638 = vmatpush3.msra.mxu0 %v665_v5 }
 0x191   :  { %640 = vmatmul.mubr.msk.f32.vlgmr.msra.gmra.mxu0 %vm72_vm0, %v488_v4 }
 0x251   :  { %v558_v57 = vpop.f32.mrf.mxu0 }
 0x252   :  { %666 = vtanh.f32 %v558_v57 }
 0x253   :  { %v641_v6 = vpop.f32.mrf.mxu0 }
 0x25f   :  { %v667_v7 = vpop.eup %666 }
 0x260   :  { %v563_v8 = vmul.f32 10.0, %v667_v7 }
 0x262   :  { %565 = vst.msk [vmem:[#allocation5] sm:$0x1] %vm564_vm10, %v563_v8 }
 0x263   :  { %699 = shalt.err (!%p696_p9)
}
 0x264   :  { %577 = dma.vmem_to_hbm [thread:$0]  %s575_s10, 16, %s960_s8, [#allocation4]  }
 0x265   :  { %710 = dma.done.wait [#allocation4], 16  }
 0x266   :  { %711 = vsyncadd [#allocation4], 4294967280 }
 0x267   :  { %583 = vsyncpa [#allocation3], 1 }
 0x268   :  { %584 = vsyncpa [#allocation4], 1 }

</bundles_post_ra>
